<compile_context>
chip_gen: v7x
topology: tpu7x:2x2x1
jax: 0.10.0
libtpu: 0.0.40
codegen_flags: <defaults>
</compile_context>

<pallas_src>
import functools
import math

import jax
import jax.numpy as jnp
from jax.experimental import pallas as pl
from jax.experimental.pallas import tpu as pltpu

# Module defaults
BIT_W = 8
BIT_B = 8
SCALE_W = 2.0 ** (-5)
SCALE_B = 2.0 ** (-5)


def _is_power_of_two(s):
    s = float(s)
    if s <= 0.0:
        return False
    m, _ = math.frexp(s)
    return m == 0.5


def _round_up(v, m):
    return ((v + m - 1) // m) * m


def fake_quant(x, s, bit):
    """scale.apply(x, s, bit, half=False) forward:
       s * clip(trunc(x / s), -2**bit, 2**bit - 1)   (quant_func: .to(int) truncates toward 0)."""
    max_q = 2.0 ** bit - 1.0
    min_q = -(2.0 ** bit)
    return s * jnp.clip(jnp.trunc(x / s), min_q, max_q)


def tt_matrix_full(factors):
    """TensorTrainMatrix.full_from_factors: cores factors[k] have shape
    [r_k, m_k, n_k, r_{k+1}]; returns the full matrix [prod(m_k), prod(n_k)]
    = [out_features, in_features].  (Used for the pure-JAX reference.)"""
    res = factors[0]                                  # [1, m0, n0, r1]
    for f in factors[1:]:
        res = jnp.einsum('amnr,rpqs->ampnqs', res, f)
        a, M, m, N, n, r2 = res.shape
        res = res.reshape(a, M * m, N * n, r2)
    return res[0, :, :, 0]                            # [out_features, in_features]


def tt_matrix_full_transposed(factors):
    """Build W.T = [in_features, out_features] directly from the TT cores, avoiding a
    full-matrix transpose/relayout of W before the kernel streams it."""
    res = jnp.transpose(factors[0], (0, 2, 1, 3))     # [1, n0, m0, r1]
    for f in factors[1:]:                             # f: [r, m_k, n_k, r']
        res = jnp.einsum('anmr,rpqs->anqmps', res, f)
        a, N, n, M, m, r2 = res.shape
        res = res.reshape(a, N * n, M * m, r2)
    return res[0, :, :, 0]                            # [in_features, out_features]


def _q_linear_kernel(x_ref, wt_ref, qb_ref, o_ref, *, scale_b, inv_scale_b, bit_b):
    """Tiled quantized linear.  The output block's index map is k-invariant so o_ref is
    VMEM-resident across the K reduction and doubles as the f32 accumulator:
      k==0:     o = 0
      every k:  o += x_tile(bf16) @ wt_tile(bf16)   (f32 accumulate on the MXU)
      k==last:  o = scale_b * clip(trunc(o * 1/scale_b), -2**bit_b, 2**bit_b - 1) + qbias
    """
    k = pl.program_id(2)

    @pl.when(k == 0)
    def _():
        o_ref[...] = jnp.zeros_like(o_ref)

    # bf16 x bf16 -> native MXU rate; f32 accumulation via preferred_element_type.
    o_ref[...] += jnp.dot(x_ref[...], wt_ref[...], preferred_element_type=jnp.float32)

    @pl.when(k == pl.num_programs(2) - 1)
    def _():
        max_q = 2.0 ** bit_b - 1.0
        min_q = -(2.0 ** bit_b)
        # inv multiply is exact because scale_b is a power of two (asserted in prep).
        y_q = scale_b * jnp.clip(jnp.trunc(o_ref[...] * inv_scale_b), min_q, max_q)
        o_ref[...] = y_q + qb_ref[...]


def prepare_tt_weight(factors, bias, *, scale_w=SCALE_W, scale_b=SCALE_B,
                      bit_w=BIT_W, bit_b=BIT_B, tile_n=256, tile_k=1024):
    """One-time weight preparation (eval-mode weights are static -- cache the result):
    quantize the TT cores, reconstruct W.T directly, pad to tile multiples, cast to
    bfloat16, and fake-quantize + pad the bias.  Returns a dict for q_tt_linear_forward."""
    assert bit_w <= 8, "bf16 weight stream assumes bit_w <= 8 (|q| <= 256 exact in bf16)"
    assert _is_power_of_two(scale_b), (
        "kernel uses an exact reciprocal multiply for the output fake-quant; "
        "scale_b must be a power of two (or switch the kernel back to a divide)")

    q_factors = [fake_quant(U.astype(jnp.float32), scale_w, bit_w) for U in factors]
    wt = tt_matrix_full_transposed(q_factors)          # [IN, OUT] = W.T
    IN, OUT = wt.shape

    # Clamp tiles to the (hardware-aligned) problem dims, then pad to tile multiples.
    tn = min(tile_n, _round_up(OUT, 128))
    tk = min(tile_k, _round_up(IN, 128))
    Kp = _round_up(IN, tk)
    Np = _round_up(OUT, tn)

    wt_p = jnp.pad(wt, ((0, Kp - IN), (0, Np - OUT))).astype(jnp.bfloat16)

    # Grid-invariant bias fake-quantization done once, outside the kernel.
    qb = fake_quant(bias.astype(jnp.float32), scale_b, bit_b)
    qb_p = jnp.pad(qb, (0, Np - OUT)).reshape(1, Np)

    return dict(wt=wt_p, qb=qb_p, in_features=IN, out_features=OUT,
                tn=tn, tk=tk, scale_b=float(scale_b), bit_b=int(bit_b))


def q_tt_linear_forward(x, prep, *, tile_m=1024):
    """Forward pass given prepared weights.  x: [B, in_features] (any float dtype)."""
    B, IN = x.shape
    assert IN == prep["in_features"]
    wt_p, qb_p = prep["wt"], prep["qb"]
    Kp, Np = wt_p.shape
    tn, tk = prep["tn"], prep["tk"]
    OUT = prep["out_features"]

    # bf16 activations -> 16-row sublane minimum for the x tile; one M tile when
    # B <= tile_m so the dominant W.T stream reads HBM exactly once.
    tm = min(_round_up(tile_m, 16), _round_up(B, 16))
    Bp = _round_up(B, tm)
    x_p = jnp.pad(x.astype(jnp.bfloat16), ((0, Bp - B), (0, Kp - IN)))

    grid_m, grid_n, grid_k = Bp // tm, Np // tn, Kp // tk

    # Megacore (v7x has 2 TensorCores): ensure the parallel extent is >= 2 when possible.
    if grid_m * grid_n == 1 and Np % 256 == 0:
        tn = Np // 2
        grid_n = 2

    # Right-sized VMEM budget from the actual double-buffered tile footprint (+headroom),
    # instead of a blanket reservation that squeezes v7x's 64 MiB.
    vmem_bytes = (2 * tm * tk * 2        # x tiles (bf16, double-buffered)
                  + 2 * tk * tn * 2      # W.T tiles (bf16, double-buffered)
                  + 2 * tm * tn * 4      # output / accumulator tiles (f32)
                  + 2 * 1 * tn * 4)      # quantized bias tiles
    vmem_limit = int(min(128 * 1024 * 1024, max(2 * vmem_bytes, 16 * 1024 * 1024)))

    kernel = functools.partial(_q_linear_kernel,
                               scale_b=prep["scale_b"],
                               inv_scale_b=1.0 / prep["scale_b"],
                               bit_b=prep["bit_b"])
    out = pl.pallas_call(
        kernel,
        out_shape=jax.ShapeDtypeStruct((Bp, Np), jnp.float32),
        grid=(grid_m, grid_n, grid_k),
        in_specs=[
            pl.BlockSpec((tm, tk), lambda i, j, k: (i, k)),   # x tile (bf16)
            pl.BlockSpec((tk, tn), lambda i, j, k: (k, j)),   # W.T tile (bf16)
            pl.BlockSpec((1, tn), lambda i, j, k: (0, j)),    # quantized bias tile
        ],
        out_specs=pl.BlockSpec((tm, tn), lambda i, j, k: (i, j)),
        compiler_params=pltpu.CompilerParams(
            dimension_semantics=("parallel", "parallel", "arbitrary"),
            vmem_limit_bytes=vmem_limit),
    )(x_p, wt_p, qb_p)
    return out[:B, :OUT]


def q_tensorized_linear(x, factors, bias, *, scale_w=SCALE_W, scale_b=SCALE_B,
                        bit_w=BIT_W, bit_b=BIT_B,
                        tile_m=1024, tile_n=256, tile_k=1024):
    """Convenience one-shot wrapper (prep + forward).  For repeated eval-mode calls,
    call prepare_tt_weight once and reuse the result with q_tt_linear_forward."""
    prep = prepare_tt_weight(factors, bias, scale_w=scale_w, scale_b=scale_b,
                             bit_w=bit_w, bit_b=bit_b, tile_n=tile_n, tile_k=tile_k)
    return q_tt_linear_forward(x, prep, tile_m=tile_m)


def _reference(x, factors, bias, scale_w, scale_b, bit_w, bit_b):
    q_factors = [fake_quant(U, scale_w, bit_w) for U in factors]
    w = tt_matrix_full(q_factors)                     # [OUT, IN]
    return fake_quant(x @ w.T, scale_b, bit_b) + fake_quant(bias, scale_b, bit_b)


def _check(out, ref):
    # Outputs of both paths are scale_b-quantized + the same quantized bias, so the
    # difference is an integer multiple of scale_b.  bf16 weight/activation streams can
    # shift an element across a trunc boundary by one step; allow that, and guard the
    # overall result with a mean-error bound (real bugs produce O(1) errors).
    diff = jnp.abs(out - ref)
    assert float(jnp.max(diff)) <= 2.0 * SCALE_B + 1e-5
    assert float(jnp.mean(diff)) <= 0.5 * SCALE_B


if __name__ == "__main__":
    key = jax.random.PRNGKey(0)
    k1, k2, k3, k4, k5, k6, k7 = jax.random.split(key, 7)

    # --- Case 1: tiny shapes (module-like toy): IN = 4*8 = 32, OUT = 4*4 = 16 ---
    B1 = 8
    out_dims1, in_dims1, ranks1 = (4, 4), (4, 8), (1, 5, 1)
    IN1 = in_dims1[0] * in_dims1[1]
    OUT1 = out_dims1[0] * out_dims1[1]
    f0 = 0.3 * jax.random.normal(k1, (ranks1[0], out_dims1[0], in_dims1[0], ranks1[1]), jnp.float32)
    f1 = 0.3 * jax.random.normal(k2, (ranks1[1], out_dims1[1], in_dims1[1], ranks1[2]), jnp.float32)
    factors1 = [f0, f1]
    bias1 = jnp.zeros((OUT1,), jnp.float32)           # module initializes bias to zeros
    x1 = jax.random.normal(k3, (B1, IN1), jnp.float32)

    prep1 = prepare_tt_weight(factors1, bias1)        # prepared once, reusable across calls
    out1 = q_tt_linear_forward(x1, prep1)
    out1 = jax.block_until_ready(out1)
    ref1 = _reference(x1, factors1, bias1, SCALE_W, SCALE_B, BIT_W, BIT_B)
    assert out1.shape == (B1, OUT1)
    _check(out1, ref1)

    # --- Case 2: exercises multi-step K reduction, N tiling, padding and nonzero bias ---
    B2 = 16
    out_dims2, in_dims2, ranks2 = (12, 12), (16, 16), (1, 6, 1)
    IN2 = in_dims2[0] * in_dims2[1]                   # 256
    OUT2 = out_dims2[0] * out_dims2[1]                # 144
    g0 = 0.2 * jax.random.normal(k4, (ranks2[0], out_dims2[0], in_dims2[0], ranks2[1]), jnp.float32)
    g1 = 0.2 * jax.random.normal(k5, (ranks2[1], out_dims2[1], in_dims2[1], ranks2[2]), jnp.float32)
    factors2 = [g0, g1]
    bias2 = 0.5 * jax.random.normal(k6, (OUT2,), jnp.float32)
    x2 = jax.random.normal(k7, (B2, IN2), jnp.float32)

    out2 = q_tensorized_linear(x2, factors2, bias2, tile_m=1024, tile_n=128, tile_k=128)
    out2 = jax.block_until_ready(out2)
    ref2 = _reference(x2, factors2, bias2, SCALE_W, SCALE_B, BIT_W, BIT_B)
    assert out2.shape == (B2, OUT2)
    _check(out2, ref2)

    print("KERNEL_OK")
</pallas_src>

<mosaic_0001>
module attributes {stable_mosaic.version = 11 : i64} {
  func.func @_q_linear_kernel(%arg0: i32, %arg1: i32, %arg2: i32, %arg3: memref<16x128xbf16, #tpu.memory_space<vmem>>, %arg4: memref<128x128xbf16, #tpu.memory_space<vmem>>, %arg5: memref<1x128xf32, #tpu.memory_space<vmem>>, %arg6: memref<16x128xf32, #tpu.memory_space<vmem>>) attributes {dimension_semantics = [#tpu.dimension_semantics<parallel>, #tpu.dimension_semantics<parallel>, #tpu.dimension_semantics<arbitrary>], iteration_bounds = array<i64: 1, 1, 1>, scalar_prefetch = 0 : i64, scratch_operands = 0 : i64, tpu.core_type = #tpu.core_type<tc>, window_params = [{transform_indices = @transform_0, window_bounds = array<i64: 16, 128>}, {transform_indices = @transform_1, window_bounds = array<i64: 128, 128>}, {transform_indices = @transform_2, window_bounds = array<i64: 1, 128>}, {transform_indices = @transform_3, window_bounds = array<i64: 16, 128>}]} {
    %c0_i32 = arith.constant 0 : i32
    %0 = arith.cmpi eq, %arg2, %c0_i32 : i32
    %1 = arith.extui %0 : i1 to i32
    %c0_i32_0 = arith.constant 0 : i32
    %2 = arith.cmpi ne, %1, %c0_i32_0 : i32
    scf.if %2 {
      %cst_10 = arith.constant 0.000000e+00 : f32
      %12 = vector.broadcast %cst_10 : f32 to vector<16x128xf32>
      %c0_11 = arith.constant 0 : index
      %c0_12 = arith.constant 0 : index
      %13 = vector.load %arg6[%c0_11, %c0_12] : memref<16x128xf32, #tpu.memory_space<vmem>>, vector<16x128xf32>
      tpu.vector_store %arg6[%c0_11, %c0_12], %12 {strides = array<i32>} : memref<16x128xf32, #tpu.memory_space<vmem>>, vector<16x128xf32>,
    } else {
    }
    %c0 = arith.constant 0 : index
    %c0_1 = arith.constant 0 : index
    %3 = vector.load %arg6[%c0, %c0_1] : memref<16x128xf32, #tpu.memory_space<vmem>>, vector<16x128xf32>
    %c0_2 = arith.constant 0 : index
    %c0_3 = arith.constant 0 : index
    %4 = vector.load %arg3[%c0_2, %c0_3] : memref<16x128xbf16, #tpu.memory_space<vmem>>, vector<16x128xbf16>
    %c0_4 = arith.constant 0 : index
    %c0_5 = arith.constant 0 : index
    %5 = vector.load %arg4[%c0_4, %c0_5] : memref<128x128xbf16, #tpu.memory_space<vmem>>, vector<128x128xbf16>
    %cst = arith.constant dense<0.000000e+00> : vector<16x128xf32>
    %6 = tpu.matmul %4, %5, %cst {dimension_numbers = #tpu.dot_dimension_numbers<[1], [0], [0], [1], [0, 0, 1, 1], [], []>} : vector<16x128xbf16>, vector<128x128xbf16>, vector<16x128xf32> -> vector<16x128xf32>
    %7 = arith.addf %3, %6 : vector<16x128xf32>
    %c0_6 = arith.constant 0 : index
    %c0_7 = arith.constant 0 : index
    %8 = vector.load %arg6[%c0_6, %c0_7] : memref<16x128xf32, #tpu.memory_space<vmem>>, vector<16x128xf32>
    tpu.vector_store %arg6[%c0_6, %c0_7], %7 {strides = array<i32>} : memref<16x128xf32, #tpu.memory_space<vmem>>, vector<16x128xf32>,
    %c0_i32_8 = arith.constant 0 : i32
    %9 = arith.cmpi eq, %arg2, %c0_i32_8 : i32
    %10 = arith.extui %9 : i1 to i32
    %c0_i32_9 = arith.constant 0 : i32
    %11 = arith.cmpi ne, %10, %c0_i32_9 : i32
    scf.if %11 {
      %c0_10 = arith.constant 0 : index
      %c0_11 = arith.constant 0 : index
      %12 = vector.load %arg6[%c0_10, %c0_11] : memref<16x128xf32, #tpu.memory_space<vmem>>, vector<16x128xf32>
      %cst_12 = arith.constant 3.200000e+01 : f32
      %13 = vector.broadcast %cst_12 : f32 to vector<16x128xf32>
      %14 = arith.mulf %12, %13 : vector<16x128xf32>
      %cst_13 = arith.constant 0.000000e+00 : f32
      %15 = vector.broadcast %cst_13 : f32 to vector<16x128xf32>
      %16 = arith.cmpf olt, %14, %15 : vector<16x128xf32>
      %17 = math.ceil %14 : vector<16x128xf32>
      %18 = math.floor %14 : vector<16x128xf32>
      %19 = arith.select %16, %17, %18 : vector<16x128xi1>, vector<16x128xf32>
      %cst_14 = arith.constant -2.560000e+02 : f32
      %cst_15 = arith.constant 2.550000e+02 : f32
      %20 = vector.broadcast %cst_14 : f32 to vector<16x128xf32>
      %21 = arith.maximumf %20, %19 : vector<16x128xf32>
      %22 = vector.broadcast %cst_15 : f32 to vector<16x128xf32>
      %23 = arith.minimumf %22, %21 : vector<16x128xf32>
      %cst_16 = arith.constant 3.125000e-02 : f32
      %24 = vector.broadcast %cst_16 : f32 to vector<16x128xf32>
      %25 = arith.mulf %24, %23 : vector<16x128xf32>
      %c0_17 = arith.constant 0 : index
      %c0_18 = arith.constant 0 : index
      %26 = vector.load %arg5[%c0_17, %c0_18] : memref<1x128xf32, #tpu.memory_space<vmem>>, vector<1x128xf32>
      %27 = vector.broadcast %26 : vector<1x128xf32> to vector<16x128xf32>
      %28 = arith.addf %25, %27 : vector<16x128xf32>
      %c0_19 = arith.constant 0 : index
      %c0_20 = arith.constant 0 : index
      %29 = vector.load %arg6[%c0_19, %c0_20] : memref<16x128xf32, #tpu.memory_space<vmem>>, vector<16x128xf32>
      tpu.vector_store %arg6[%c0_19, %c0_20], %28 {strides = array<i32>} : memref<16x128xf32, #tpu.memory_space<vmem>>, vector<16x128xf32>,
    } else {
    }
    return
  }
  func.func @transform_0(%arg0: i32, %arg1: i32, %arg2: i32) -> (i32, i32) {
    %c0_i32 = arith.constant 0 : i32
    return %arg0, %arg2 : i32, i32
  }
  func.func @transform_1(%arg0: i32, %arg1: i32, %arg2: i32) -> (i32, i32) {
    %c0_i32 = arith.constant 0 : i32
    return %arg2, %arg1 : i32, i32
  }
  func.func @transform_2(%arg0: i32, %arg1: i32, %arg2: i32) -> (i32, i32) {
    %c0_i32 = arith.constant 0 : i32
    %c0_i32_0 = arith.constant 0 : i32
    return %c0_i32, %arg1 : i32, i32
  }
  func.func @transform_3(%arg0: i32, %arg1: i32, %arg2: i32) -> (i32, i32) {
    %c0_i32 = arith.constant 0 : i32
    return %arg0, %arg1 : i32, i32
  }
}

</mosaic_0001>

<bundles_post_ra>
// kernel: tpu_custom_call.1
= control target key start
LH: loop header
LB: loop body
LE: loop exit
PB: predicated region body
PF: predicated region fallthrough
CT: control target
= control target key end

     0   :  { %8 = vsyncpa [#allocation3], 0  ;;  %s416_s0 = inlined_call_operand.hbm [shape: bf16[16,128], index: 0, kind: input, shape index: {}]   ;;  %s417_s1 = inlined_call_operand.hbm [shape: bf16[128,128], index: 1, kind: input, shape index: {}]   ;;  %s418_s2 = inlined_call_operand.vmem [shape: f32[1,128], index: 2, kind: input, shape index: {}]   ;;  %s419_s3 = inlined_call_operand.hbm [shape: f32[16,128], index: 3, kind: output, shape index: {}]  }
   0x1   :  { %9 = vsyncpa [#allocation6], 0 }
   0x2   :  { %10 = vsyncpa [#allocation4], 0  ;;  %s348_s12 = smov [#allocation2]   ;;  %s276_s16 = scalar_lea.hbm %s416_s0, 128 }
   0x3   :  { %s16_s13 = sshll.u32 %s348_s12, 4  ;;  %p277_p0 = scmp.ne.s32.totalorder %s416_s0, %s276_s16  ;;  %s17_s13 = int_to_ptr.vmem [resolvable:$true] %s16_s13 }
   0x4   :  { %p280_p1 = scmp.lt.u32.totalorder %s276_s16, %s416_s0 }
   0x6   :  { %p282_p2 = pnand %p280_p1, %p277_p0 }
   0x8   :  { %285 = shalt.err (!%p282_p2)
}
   0x9   :  { %s286_s21 = scalar_lea.vmem %s17_s13, 128  ;;  %p291_p4 = scmp.lt.s32.totalorder %s17_s13, %s17_s13 }
   0xa   :  { %p287_p3 = scmp.ne.s32.totalorder %s17_s13, %s286_s21  ;;  %p292_p5 = scmp.lt.s32.totalorder %s286_s21, %s286_s21 }
   0xc   :  { %p293_p6 = por %p292_p5, %p291_p4 }
   0xe   :  { %p294_p7 = pnand %p293_p6, %p287_p3 }
  0x10   :  { %297 = shalt.err (!%p294_p7)
}
  0x11   :  { %s349_s22 = smov 64   ;;  %s350_s23 = smov 4  }
  0x12   :  { %22 = dma.hbm_to_vmem [thread:$0]  %s416_s0, 128, %s17_s13, [#allocation3], %s349_s22, %s349_s22, %s350_s23  }
  0x13   :  { %s351_s26 = smov [#allocation5]   ;;  %s298_s30 = scalar_lea.hbm %s417_s1, 1024 }
  0x14   :  { %s28_s27 = sshll.u32 %s351_s26, 4  ;;  %p299_p8 = scmp.ne.s32.totalorder %s417_s1, %s298_s30  ;;  %s29_s27 = int_to_ptr.vmem [resolvable:$true] %s28_s27 }
  0x15   :  { %p302_p9 = scmp.lt.u32.totalorder %s298_s30, %s417_s1 }
  0x17   :  { %p304_p10 = pnand %p302_p9, %p299_p8 }
  0x19   :  { %307 = shalt.err (!%p304_p10)
}
  0x1a   :  { %s308_s8 = scalar_lea.vmem %s29_s27, 1024  ;;  %p313_p12 = scmp.lt.s32.totalorder %s29_s27, %s29_s27 }
  0x1b   :  { %p309_p11 = scmp.ne.s32.totalorder %s29_s27, %s308_s8  ;;  %p314_p13 = scmp.lt.s32.totalorder %s308_s8, %s308_s8 }
  0x1d   :  { %p315_p0 = por %p314_p13, %p313_p12 }
  0x1f   :  { %p316_p1 = pnand %p315_p0, %p309_p11 }
  0x21   :  { %319 = shalt.err (!%p316_p1)
}
  0x22   :  { %34 = dma.hbm_to_vmem [thread:$0]  %s417_s1, 1024, %s29_s27, [#allocation6], %s349_s22, %s349_s22, %s350_s23  }
  0x23   :  { %342 = dma.done.wait [#allocation3], 128  }
  0x24   :  { %343 = vsyncadd [#allocation3], 4294967168 }
  0x25   :  { %344 = dma.done.wait [#allocation6], 1024  }
  0x26   :  { %345 = vsyncadd [#allocation6], 4294966272  ;;  %v352_v0 = vmov 0.0   ;;  %vm353_vm0 = vmmov 0   ;;  %v267_v1 = vld [vmem:[#allocation5] sm:$0xff]   ;;  %v268_v2 = vld [vmem:[#allocation5 + $0x8] sm:$0xff]  }
  0x27   :  { %238 = vmatprep.subr.bf16.mxu0 %v352_v0  ;;  %254 = vmatprep.mubr.msk.bf16.mxu0 %vm353_vm0, %v352_v0  ;;  %v269_v3 = vld [vmem:[#allocation5 + $0x10] sm:$0xff]   ;;  %v270_v4 = vld [vmem:[#allocation5 + $0x18] sm:$0xff]   ;;  %v271_v5 = vld [vmem:[#allocation5 + $0x20] sm:$0xff]   ;;  %s354_s11 = smov [#allocation7]  }
  0x28   :  { %239 = vmatpush3.bf16.msra.mxu0 %v267_v1  ;;  %v272_v6 = vld [vmem:[#allocation5 + $0x28] sm:$0xff]   ;;  %v273_v7 = vld [vmem:[#allocation5 + $0x30] sm:$0xff]   ;;  %v274_v8 = vld [vmem:[#allocation5 + $0x38] sm:$0xff]   ;;  %s206_s12 = sshll.u32 %s354_s11, 4  ;;  %s207_s12 = int_to_ptr.vmem [resolvable:$true] %s206_s12 }
  0x29   :  { %240 = vmatprep.subr.bf16.mxu0 %v352_v0  ;;  %v275_v9 = vld [vmem:[#allocation2] sm:$0xff]   ;;  %s320_s13 = scalar_lea.vmem %s207_s12, 256  ;;  %p325_p3 = scmp.lt.s32.totalorder %s207_s12, %s207_s12 }
  0x2a   :  { %v228_v25 = vld [vmem:[%s418_s2] ss:$0 sm:$0xff]  ;;  %p321_p2 = scmp.ne.s32.totalorder %s207_s12, %s320_s13  ;;  %p326_p4 = scmp.lt.s32.totalorder %s320_s13, %s320_s13 }
  0x2c   :  { %241 = vmatpush3.bf16.msra.mxu0 %v268_v2  ;;  %p327_p5 = por %p326_p4, %p325_p3 }
  0x2d   :  { %242 = vmatprep.subr.bf16.mxu0 %v352_v0 }
  0x2e   :  { %p328_p6 = pnand %p327_p5, %p321_p2 }
  0x30   :  { %243 = vmatpush3.bf16.msra.mxu0 %v269_v3 }
  0x31   :  { %244 = vmatprep.subr.bf16.mxu0 %v352_v0 }
  0x34   :  { %245 = vmatpush3.bf16.msra.mxu0 %v270_v4 }
  0x35   :  { %246 = vmatprep.subr.bf16.mxu0 %v352_v0 }
  0x38   :  { %247 = vmatpush3.bf16.msra.mxu0 %v271_v5 }
  0x39   :  { %248 = vmatprep.subr.bf16.mxu0 %v352_v0 }
  0x3c   :  { %249 = vmatpush3.bf16.msra.mxu0 %v272_v6 }
  0x3d   :  { %250 = vmatprep.subr.bf16.mxu0 %v352_v0 }
  0x40   :  { %251 = vmatpush3.bf16.msra.mxu0 %v273_v7 }
  0x41   :  { %252 = vmatprep.subr.bf16.mxu0 %v352_v0 }
  0x44   :  { %253 = vmatpush3.bf16.msra.mxu0 %v274_v8 }
  0x47   :  { %255 = vmatmul.mubr.bf16.vlgmr.msra.gmra.mrb[0].mxu0 %v275_v9 }
 0x11a   :  { %v158_v10 = vpop.f32.mrb[0].mxu0 }
 0x11b   :  { %v256_v11 = vpop.f32.mrb[1].mxu0  ;;  %v174_v14 = vmul.f32 32.0, %v158_v10 }
 0x11c   :  { %v161_v12 = vpop.f32.mrb[2].mxu0 }
 0x11d   :  { %v257_v13 = vpop.f32.mrb[3].mxu0  ;;  %v175_v15 = vmul.f32 32.0, %v161_v12  ;;  %vm176_vm1 = vcmp.lt.f32.partialorder %v174_v14, 0.0  ;;  %v178_v16 = vceil.f32 %v174_v14  ;;  %v180_v17 = vfloor.f32 %v174_v14 }
 0x11f   :  { %vm177_vm2 = vcmp.lt.f32.partialorder %v175_v15, 0.0  ;;  %v179_v18 = vceil.f32 %v175_v15  ;;  %v181_v19 = vfloor.f32 %v175_v15  ;;  %v182_v20 = vsel %vm176_vm1, %v178_v16, %v180_v17 }
 0x120   :  { %v184_v21 = vmax.f32 %v182_v20, -256.0 }
 0x121   :  { %v183_v22 = vsel %vm177_vm2, %v179_v18, %v181_v19 }
 0x122   :  { %v185_v23 = vmax.f32 %v183_v22, -256.0  ;;  %v186_v24 = vmin.f32 %v184_v21, 255.0 }
 0x124   :  { %v187_v26 = vmin.f32 %v185_v23, 255.0  ;;  %v188_v27 = vmul.f32 0.03125, %v186_v24 }
 0x126   :  { %v189_v28 = vmul.f32 0.03125, %v187_v26  ;;  %v197_v29 = vadd.f32 %v228_v25, %v188_v27 }
 0x128   :  { %v198_v30 = vadd.f32 %v228_v25, %v189_v28  ;;  %199 = vst [vmem:[#allocation7] sm:$0xff] %v197_v29 }
 0x12a   :  { %200 = vst [vmem:[#allocation7 + $0x8] sm:$0xff] %v198_v30 }
 0x12b   :  { %331 = shalt.err (!%p328_p6)
}
 0x12c   :  { %s332_s2 = scalar_lea.hbm %s419_s3, 256 }
 0x12d   :  { %p333_p7 = scmp.ne.s32.totalorder %s419_s3, %s332_s2  ;;  %p336_p8 = scmp.lt.u32.totalorder %s332_s2, %s419_s3 }
 0x12f   :  { %p338_p9 = pnand %p336_p8, %p333_p7 }
 0x131   :  { %341 = shalt.err (!%p338_p9)
}
 0x132   :  { %s355_s20 = smov 128   ;;  %s356_s21 = smov 8  }
 0x133   :  { %212 = dma.vmem_to_hbm [thread:$0]  %s207_s12, 256, %s419_s3, [#allocation4], %s355_s20, %s355_s20, %s356_s21  }
 0x134   :  { %346 = dma.done.wait [#allocation4], 256  }
 0x135   :  { %347 = vsyncadd [#allocation4], 4294967040 }
 0x136   :  { %216 = vsyncpa [#allocation3], 1 }
 0x137   :  { %217 = vsyncpa [#allocation6], 1 }
 0x138   :  { %218 = vsyncpa [#allocation4], 1 }

</bundles_post_ra>
